<compile_context>
chip_gen: v5e
topology: v5e:2x2
jax: 0.10.0
libtpu: 0.0.40
codegen_flags: <defaults>
</compile_context>

<pallas_src>
import jax
import jax.numpy as jnp
from jax import lax
from jax.experimental import pallas as pl
from jax.experimental.pallas import tpu as pltpu


def rnn_from_cell(x, w_ih, w_hh, b_ih, b_hh, *, batch_first=False,
                  time_block=None, batch_block=None, param_dtype=jnp.float32):
    """x: (T, B, D) [or (B, T, D) if batch_first]; w_ih: (H, D); w_hh: (H, H);
    b_ih, b_hh: (H,). Returns (all_hx, hx) like RNNFromCell.forward.

    Stack independent sequences along the batch dimension before calling: one
    pallas_call amortizes the launch cost and feeds the parallel batch axis."""
    if batch_first:
        x = jnp.transpose(x, (1, 0, 2))
    T, B, D = x.shape
    H = w_ih.shape[0]
    out_dtype = x.dtype

    TT = T if time_block is None else time_block
    assert T % TT == 0, "time_block must divide T"
    n_tblocks = T // TT

    # Pad batch to a full 8-sublane tile so every per-step op is full-width.
    Bp = ((B + 7) // 8) * 8
    BB = Bp if batch_block is None else batch_block
    assert BB % 8 == 0 and Bp % BB == 0, "batch_block must be a multiple of 8"
    n_bblocks = Bp // BB

    x_pad = x if Bp == B else jnp.pad(x, ((0, 0), (0, Bp - B), (0, 0)))
    x_pad = x_pad.astype(param_dtype)                                  # (T, Bp, D)

    # Glue in plain JAX: pre-transpose weights, fuse the two biases.
    wih_t = jnp.transpose(w_ih).astype(param_dtype)                    # (D, H)
    whh_t = jnp.transpose(w_hh).astype(param_dtype)                    # (H, H)
    b = (b_ih.astype(jnp.float32) + b_hh.astype(jnp.float32)).reshape(1, H)

    def kernel(x_ref, wih_ref, whh_ref, b_ref, allh_ref, h_scr, xp_scr, hs_scr):
        # x_ref: (TT, BB, D); wih_ref: (D, H); whh_ref: (H, H); b_ref: (1, H)
        # allh_ref: (TT, BB, H) output block.
        # h_scr: (BB, H) f32 carried hidden state (persists across the
        #        sequential TIME grid axis, per batch block / per core).
        # xp_scr: (TT, BB, H) f32 staged input projection.
        # hs_scr: (TT, BB, H) f32 per-step results, bulk-stored once per block.

        # Time is grid axis 1 (innermost, sequential). Reset the carried h at
        # the start of every batch block's time sweep.
        @pl.when(pl.program_id(1) == 0)
        def _():
            h_scr[...] = jnp.zeros_like(h_scr)          # h_0 = 0 (hx=None)

        # Hoisted input projection for the whole time block: one MXU matmul
        # with f32 accumulation + fused bias, staged to VMEM so the serial
        # loop only does aligned loads + the tiny recurrent matmul + tanh.
        x_flat = x_ref[...].reshape(TT * BB, D)          # BB % 8 == 0 -> no-op
        xp = jnp.dot(x_flat, wih_ref[...],
                     preferred_element_type=jnp.float32) + b_ref[...]
        xp_scr[...] = xp.reshape(TT, BB, H)

        whh = whh_ref[...]

        def step(t, h):
            pre = xp_scr[t] + jnp.dot(h.astype(whh.dtype), whh,
                                      preferred_element_type=jnp.float32)
            h_new = jnp.tanh(pre)
            hs_scr[t] = h_new
            return h_new

        if TT <= 8:
            # Small time blocks: static unroll (tiny body, full LLO visibility).
            h = h_scr[...]
            for t in range(TT):
                h = step(t, h)
            h_scr[...] = h
        else:
            # Larger time blocks: moderately-unrolled fori_loop bounds live
            # ranges / vreg pressure and keeps compile time sane.
            h_scr[...] = lax.fori_loop(0, TT, step, h_scr[...], unroll=8)

        # One bulk cast + store per time block (no per-step layout work).
        allh_ref[...] = hs_scr[...].astype(allh_ref.dtype)

    # VMEM budget: raise the scoped limit only when resident weights plus the
    # (double-buffered) x/out blocks and scratches would exceed the usual
    # default. Cap at 64 MiB so the setting stays legal on v7x (v5e/v6e's
    # 128 MiB can go higher if ever needed).
    psize = jnp.dtype(param_dtype).itemsize
    osize = jnp.dtype(out_dtype).itemsize
    est = (2 * TT * BB * D * psize              # x block (double-buffered)
           + 2 * TT * BB * H * osize            # out block (double-buffered)
           + 2 * (D * H + H * H + H) * psize    # weights + bias (conservative 2x)
           + (BB * H + 2 * TT * BB * H) * 4)    # f32 scratches
    vmem_limit = None
    if est > 24 * 1024 * 1024:
        vmem_limit = min(max(int(est * 1.5), 32 * 1024 * 1024), 64 * 1024 * 1024)

    all_hx = pl.pallas_call(
        kernel,
        out_shape=jax.ShapeDtypeStruct((T, Bp, H), out_dtype),
        grid_spec=pltpu.PrefetchScalarGridSpec(
            num_scalar_prefetch=0,
            grid=(n_bblocks, n_tblocks),                 # batch outer, time inner
            in_specs=[
                pl.BlockSpec((TT, BB, D), lambda bi, ti: (ti, bi, 0)),  # x block
                pl.BlockSpec((D, H), lambda bi, ti: (0, 0)),            # W_ih^T
                pl.BlockSpec((H, H), lambda bi, ti: (0, 0)),            # W_hh^T
                pl.BlockSpec((1, H), lambda bi, ti: (0, 0)),            # fused bias
            ],
            out_specs=pl.BlockSpec((TT, BB, H), lambda bi, ti: (ti, bi, 0)),
            scratch_shapes=[
                pltpu.VMEM((BB, H), jnp.float32),        # carried hidden state
                pltpu.VMEM((TT, BB, H), jnp.float32),    # staged x @ W_ih^T + b
                pltpu.VMEM((TT, BB, H), jnp.float32),    # per-step h results
            ],
        ),
        compiler_params=pltpu.CompilerParams(
            dimension_semantics=("parallel", "arbitrary"),  # batch ||, time seq
            vmem_limit_bytes=vmem_limit),
    )(x_pad, wih_t, whh_t, b)

    all_hx = all_hx[:, :B, :]                           # drop batch padding
    h_last = all_hx[T - 1:T]                            # (1, B, H)
    if batch_first:
        all_hx = jnp.transpose(all_hx, (1, 0, 2))
    return all_hx, h_last


def rnn_from_cell_ref(x, w_ih, w_hh, b_ih, b_hh):
    """Pure-JAX reference of the same unroll (correctness self-check)."""
    T, B, _ = x.shape
    H = w_ih.shape[0]
    h = jnp.zeros((B, H), jnp.float32)
    hs = []
    for t in range(T):
        h = jnp.tanh(x[t] @ w_ih.T + b_ih + h @ w_hh.T + b_hh)
        hs.append(h)
    return jnp.stack(hs), h[None]


if __name__ == "__main__":
    # Small shapes consistent with the module's forward: seq=8, batch=4,
    # input_size=16, hidden_size=32.
    T, B, D, H = 8, 4, 16, 32

    key = jax.random.PRNGKey(0)
    kx, k1, k2, k3, k4 = jax.random.split(key, 5)

    bound = 1.0 / jnp.sqrt(H)
    x = jax.random.normal(kx, (T, B, D), jnp.float32)
    w_ih = jax.random.uniform(k1, (H, D), jnp.float32, -bound, bound)
    w_hh = jax.random.uniform(k2, (H, H), jnp.float32, -bound, bound)
    b_ih = jax.random.uniform(k3, (H,), jnp.float32, -bound, bound)
    b_hh = jax.random.uniform(k4, (H,), jnp.float32, -bound, bound)

    ref_all, ref_last = rnn_from_cell_ref(x, w_ih, w_hh, b_ih, b_hh)

    # f32 path (bit-faithful to the PyTorch module), whole sequence in one block.
    all_hx, h_last = rnn_from_cell(x, w_ih, w_hh, b_ih, b_hh)
    jax.block_until_ready((all_hx, h_last))
    assert all_hx.shape == (T, B, H) and h_last.shape == (1, B, H)
    assert jnp.allclose(all_hx, ref_all, atol=1e-5, rtol=1e-5)
    assert jnp.allclose(h_last, ref_last, atol=1e-5, rtol=1e-5)

    # Multi-time-block path: hidden state carried across sequential grid steps.
    all_tb, last_tb = rnn_from_cell(x, w_ih, w_hh, b_ih, b_hh, time_block=4)
    jax.block_until_ready((all_tb, last_tb))
    assert jnp.allclose(all_tb, ref_all, atol=1e-5, rtol=1e-5)
    assert jnp.allclose(last_tb, ref_last, atol=1e-5, rtol=1e-5)

    # batch_first=True semantics (all_hx transposed, hx unchanged).
    all_bf1, last_bf1 = rnn_from_cell(jnp.transpose(x, (1, 0, 2)), w_ih, w_hh,
                                      b_ih, b_hh, batch_first=True)
    jax.block_until_ready((all_bf1, last_bf1))
    assert all_bf1.shape == (B, T, H)
    assert jnp.allclose(all_bf1, jnp.transpose(ref_all, (1, 0, 2)),
                        atol=1e-5, rtol=1e-5)
    assert jnp.allclose(last_bf1, ref_last, atol=1e-5, rtol=1e-5)

    # bf16 weights/activations (MXU-native on v5e/v6e/v7x), f32 accumulation —
    # looser tolerance through the tanh recurrence; opt-in only.
    all_b16, last_b16 = rnn_from_cell(x, w_ih, w_hh, b_ih, b_hh,
                                      param_dtype=jnp.bfloat16)
    jax.block_until_ready((all_b16, last_b16))
    assert jnp.allclose(all_b16, ref_all, atol=5e-2, rtol=5e-2)
    assert jnp.allclose(last_b16, ref_last, atol=5e-2, rtol=5e-2)

    # Longer sequence exercising the in-kernel fori_loop (TT > 8) path.
    T2 = 32
    x_long = jax.random.normal(jax.random.PRNGKey(1), (T2, B, D), jnp.float32)
    ref2_all, ref2_last = rnn_from_cell_ref(x_long, w_ih, w_hh, b_ih, b_hh)
    all2, last2 = rnn_from_cell(x_long, w_ih, w_hh, b_ih, b_hh)
    jax.block_until_ready((all2, last2))
    assert all2.shape == (T2, B, H) and last2.shape == (1, B, H)
    assert jnp.allclose(all2, ref2_all, atol=1e-5, rtol=1e-5)
    assert jnp.allclose(last2, ref2_last, atol=1e-5, rtol=1e-5)

    print("KERNEL_OK")
</pallas_src>

<mosaic_0001>
module attributes {stable_mosaic.version = 11 : i64} {
  func.func @kernel(%arg0: i32, %arg1: i32, %arg2: memref<8x8x16xf32, #tpu.memory_space<vmem>>, %arg3: memref<16x32xf32, #tpu.memory_space<vmem>>, %arg4: memref<32x32xf32, #tpu.memory_space<vmem>>, %arg5: memref<1x32xf32, #tpu.memory_space<vmem>>, %arg6: memref<8x8x32xf32, #tpu.memory_space<vmem>>, %arg7: memref<8x32xf32, #tpu.memory_space<vmem>>, %arg8: memref<8x8x32xf32, #tpu.memory_space<vmem>>, %arg9: memref<8x8x32xf32, #tpu.memory_space<vmem>>) attributes {dimension_semantics = [#tpu.dimension_semantics<parallel>, #tpu.dimension_semantics<arbitrary>], iteration_bounds = array<i64: 1, 1>, scalar_prefetch = 0 : i64, scratch_operands = 3 : i64, tpu.core_type = #tpu.core_type<tc>, window_params = [{transform_indices = @transform_0, window_bounds = array<i64: 8, 8, 16>}, {pipeline_mode = #tpu.pipeline_mode<synchronous>, transform_indices = @transform_1, window_bounds = array<i64: 16, 32>}, {pipeline_mode = #tpu.pipeline_mode<synchronous>, transform_indices = @transform_2, window_bounds = array<i64: 32, 32>}, {pipeline_mode = #tpu.pipeline_mode<synchronous>, transform_indices = @transform_3, window_bounds = array<i64: 1, 32>}, {transform_indices = @transform_4, window_bounds = array<i64: 8, 8, 32>}]} {
    %c0_i32 = arith.constant 0 : i32
    %0 = arith.cmpi eq, %arg1, %c0_i32 : i32
    %1 = arith.extui %0 : i1 to i32
    %c0_i32_0 = arith.constant 0 : i32
    %2 = arith.cmpi ne, %1, %c0_i32_0 : i32
    scf.if %2 {
      %cst_71 = arith.constant 0.000000e+00 : f32
      %81 = vector.broadcast %cst_71 : f32 to vector<8x32xf32>
      %c0_72 = arith.constant 0 : index
      %c0_73 = arith.constant 0 : index
      %82 = vector.load %arg7[%c0_72, %c0_73] : memref<8x32xf32, #tpu.memory_space<vmem>>, vector<8x32xf32>
      tpu.vector_store %arg7[%c0_72, %c0_73], %81 {strides = array<i32>} : memref<8x32xf32, #tpu.memory_space<vmem>>, vector<8x32xf32>,
    } else {
    }
    %c0 = arith.constant 0 : index
    %c0_1 = arith.constant 0 : index
    %c0_2 = arith.constant 0 : index
    %3 = vector.load %arg2[%c0, %c0_1, %c0_2] : memref<8x8x16xf32, #tpu.memory_space<vmem>>, vector<8x8x16xf32>
    %4 = vector.shape_cast %3 : vector<8x8x16xf32> to vector<64x16xf32>
    %c0_3 = arith.constant 0 : index
    %c0_4 = arith.constant 0 : index
    %5 = vector.load %arg3[%c0_3, %c0_4] : memref<16x32xf32, #tpu.memory_space<vmem>>, vector<16x32xf32>
    %cst = arith.constant dense<0.000000e+00> : vector<64x32xf32>
    %6 = tpu.matmul %4, %5, %cst {dimension_numbers = #tpu.dot_dimension_numbers<[1], [0], [0], [1], [0, 0, 1, 1], [], []>} : vector<64x16xf32>, vector<16x32xf32>, vector<64x32xf32> -> vector<64x32xf32>
    %c0_5 = arith.constant 0 : index
    %c0_6 = arith.constant 0 : index
    %7 = vector.load %arg5[%c0_5, %c0_6] : memref<1x32xf32, #tpu.memory_space<vmem>>, vector<1x32xf32>
    %8 = vector.broadcast %7 : vector<1x32xf32> to vector<64x32xf32>
    %9 = arith.addf %6, %8 : vector<64x32xf32>
    %10 = vector.shape_cast %9 : vector<64x32xf32> to vector<8x8x32xf32>
    %c0_7 = arith.constant 0 : index
    %c0_8 = arith.constant 0 : index
    %c0_9 = arith.constant 0 : index
    %11 = vector.load %arg8[%c0_7, %c0_8, %c0_9] : memref<8x8x32xf32, #tpu.memory_space<vmem>>, vector<8x8x32xf32>
    tpu.vector_store %arg8[%c0_7, %c0_8, %c0_9], %10 {strides = array<i32>} : memref<8x8x32xf32, #tpu.memory_space<vmem>>, vector<8x8x32xf32>,
    %c0_10 = arith.constant 0 : index
    %c0_11 = arith.constant 0 : index
    %12 = vector.load %arg4[%c0_10, %c0_11] : memref<32x32xf32, #tpu.memory_space<vmem>>, vector<32x32xf32>
    %c0_12 = arith.constant 0 : index
    %c0_13 = arith.constant 0 : index
    %13 = vector.load %arg7[%c0_12, %c0_13] : memref<8x32xf32, #tpu.memory_space<vmem>>, vector<8x32xf32>
    %c0_14 = arith.constant 0 : index
    %c0_15 = arith.constant 0 : index
    %c0_16 = arith.constant 0 : index
    %14 = vector.load %arg8[%c0_14, %c0_15, %c0_16] : memref<8x8x32xf32, #tpu.memory_space<vmem>>, vector<1x8x32xf32>
    %15 = vector.shape_cast %14 : vector<1x8x32xf32> to vector<8x32xf32>
    %cst_17 = arith.constant dense<0.000000e+00> : vector<8x32xf32>
    %16 = tpu.matmul %13, %12, %cst_17 {dimension_numbers = #tpu.dot_dimension_numbers<[1], [0], [0], [1], [0, 0, 1, 1], [], []>} : vector<8x32xf32>, vector<32x32xf32>, vector<8x32xf32> -> vector<8x32xf32>
    %17 = arith.addf %15, %16 : vector<8x32xf32>
    %18 = math.tanh %17 : vector<8x32xf32>
    %c0_18 = arith.constant 0 : index
    %c0_19 = arith.constant 0 : index
    %c0_20 = arith.constant 0 : index
    %19 = vector.load %arg9[%c0_18, %c0_19, %c0_20] : memref<8x8x32xf32, #tpu.memory_space<vmem>>, vector<1x8x32xf32>
    %20 = vector.shape_cast %19 : vector<1x8x32xf32> to vector<8x32xf32>
    %21 = vector.shape_cast %18 : vector<8x32xf32> to vector<1x8x32xf32>
    tpu.vector_store %arg9[%c0_18, %c0_19, %c0_20], %21 {strides = array<i32>} : memref<8x8x32xf32, #tpu.memory_space<vmem>>, vector<1x8x32xf32>,
    %c1 = arith.constant 1 : index
    %c0_21 = arith.constant 0 : index
    %c0_22 = arith.constant 0 : index
    %22 = vector.load %arg8[%c1, %c0_21, %c0_22] : memref<8x8x32xf32, #tpu.memory_space<vmem>>, vector<1x8x32xf32>
    %23 = vector.shape_cast %22 : vector<1x8x32xf32> to vector<8x32xf32>
    %cst_23 = arith.constant dense<0.000000e+00> : vector<8x32xf32>
    %24 = tpu.matmul %18, %12, %cst_23 {dimension_numbers = #tpu.dot_dimension_numbers<[1], [0], [0], [1], [0, 0, 1, 1], [], []>} : vector<8x32xf32>, vector<32x32xf32>, vector<8x32xf32> -> vector<8x32xf32>
    %25 = arith.addf %23, %24 : vector<8x32xf32>
    %26 = math.tanh %25 : vector<8x32xf32>
    %c1_24 = arith.constant 1 : index
    %c0_25 = arith.constant 0 : index
    %c0_26 = arith.constant 0 : index
    %27 = vector.load %arg9[%c1_24, %c0_25, %c0_26] : memref<8x8x32xf32, #tpu.memory_space<vmem>>, vector<1x8x32xf32>
    %28 = vector.shape_cast %27 : vector<1x8x32xf32> to vector<8x32xf32>
    %29 = vector.shape_cast %26 : vector<8x32xf32> to vector<1x8x32xf32>
    tpu.vector_store %arg9[%c1_24, %c0_25, %c0_26], %29 {strides = array<i32>} : memref<8x8x32xf32, #tpu.memory_space<vmem>>, vector<1x8x32xf32>,
    %c2 = arith.constant 2 : index
    %c0_27 = arith.constant 0 : index
    %c0_28 = arith.constant 0 : index
    %30 = vector.load %arg8[%c2, %c0_27, %c0_28] : memref<8x8x32xf32, #tpu.memory_space<vmem>>, vector<1x8x32xf32>
    %31 = vector.shape_cast %30 : vector<1x8x32xf32> to vector<8x32xf32>
    %cst_29 = arith.constant dense<0.000000e+00> : vector<8x32xf32>
    %32 = tpu.matmul %26, %12, %cst_29 {dimension_numbers = #tpu.dot_dimension_numbers<[1], [0], [0], [1], [0, 0, 1, 1], [], []>} : vector<8x32xf32>, vector<32x32xf32>, vector<8x32xf32> -> vector<8x32xf32>
    %33 = arith.addf %31, %32 : vector<8x32xf32>
    %34 = math.tanh %33 : vector<8x32xf32>
    %c2_30 = arith.constant 2 : index
    %c0_31 = arith.constant 0 : index
    %c0_32 = arith.constant 0 : index
    %35 = vector.load %arg9[%c2_30, %c0_31, %c0_32] : memref<8x8x32xf32, #tpu.memory_space<vmem>>, vector<1x8x32xf32>
    %36 = vector.shape_cast %35 : vector<1x8x32xf32> to vector<8x32xf32>
    %37 = vector.shape_cast %34 : vector<8x32xf32> to vector<1x8x32xf32>
    tpu.vector_store %arg9[%c2_30, %c0_31, %c0_32], %37 {strides = array<i32>} : memref<8x8x32xf32, #tpu.memory_space<vmem>>, vector<1x8x32xf32>,
    %c3 = arith.constant 3 : index
    %c0_33 = arith.constant 0 : index
    %c0_34 = arith.constant 0 : index
    %38 = vector.load %arg8[%c3, %c0_33, %c0_34] : memref<8x8x32xf32, #tpu.memory_space<vmem>>, vector<1x8x32xf32>
    %39 = vector.shape_cast %38 : vector<1x8x32xf32> to vector<8x32xf32>
    %cst_35 = arith.constant dense<0.000000e+00> : vector<8x32xf32>
    %40 = tpu.matmul %34, %12, %cst_35 {dimension_numbers = #tpu.dot_dimension_numbers<[1], [0], [0], [1], [0, 0, 1, 1], [], []>} : vector<8x32xf32>, vector<32x32xf32>, vector<8x32xf32> -> vector<8x32xf32>
    %41 = arith.addf %39, %40 : vector<8x32xf32>
    %42 = math.tanh %41 : vector<8x32xf32>
    %c3_36 = arith.constant 3 : index
    %c0_37 = arith.constant 0 : index
    %c0_38 = arith.constant 0 : index
    %43 = vector.load %arg9[%c3_36, %c0_37, %c0_38] : memref<8x8x32xf32, #tpu.memory_space<vmem>>, vector<1x8x32xf32>
    %44 = vector.shape_cast %43 : vector<1x8x32xf32> to vector<8x32xf32>
    %45 = vector.shape_cast %42 : vector<8x32xf32> to vector<1x8x32xf32>
    tpu.vector_store %arg9[%c3_36, %c0_37, %c0_38], %45 {strides = array<i32>} : memref<8x8x32xf32, #tpu.memory_space<vmem>>, vector<1x8x32xf32>,
    %c4 = arith.constant 4 : index
    %c0_39 = arith.constant 0 : index
    %c0_40 = arith.constant 0 : index
    %46 = vector.load %arg8[%c4, %c0_39, %c0_40] : memref<8x8x32xf32, #tpu.memory_space<vmem>>, vector<1x8x32xf32>
    %47 = vector.shape_cast %46 : vector<1x8x32xf32> to vector<8x32xf32>
    %cst_41 = arith.constant dense<0.000000e+00> : vector<8x32xf32>
    %48 = tpu.matmul %42, %12, %cst_41 {dimension_numbers = #tpu.dot_dimension_numbers<[1], [0], [0], [1], [0, 0, 1, 1], [], []>} : vector<8x32xf32>, vector<32x32xf32>, vector<8x32xf32> -> vector<8x32xf32>
    %49 = arith.addf %47, %48 : vector<8x32xf32>
    %50 = math.tanh %49 : vector<8x32xf32>
    %c4_42 = arith.constant 4 : index
    %c0_43 = arith.constant 0 : index
    %c0_44 = arith.constant 0 : index
    %51 = vector.load %arg9[%c4_42, %c0_43, %c0_44] : memref<8x8x32xf32, #tpu.memory_space<vmem>>, vector<1x8x32xf32>
    %52 = vector.shape_cast %51 : vector<1x8x32xf32> to vector<8x32xf32>
    %53 = vector.shape_cast %50 : vector<8x32xf32> to vector<1x8x32xf32>
    tpu.vector_store %arg9[%c4_42, %c0_43, %c0_44], %53 {strides = array<i32>} : memref<8x8x32xf32, #tpu.memory_space<vmem>>, vector<1x8x32xf32>,
    %c5 = arith.constant 5 : index
    %c0_45 = arith.constant 0 : index
    %c0_46 = arith.constant 0 : index
    %54 = vector.load %arg8[%c5, %c0_45, %c0_46] : memref<8x8x32xf32, #tpu.memory_space<vmem>>, vector<1x8x32xf32>
    %55 = vector.shape_cast %54 : vector<1x8x32xf32> to vector<8x32xf32>
    %cst_47 = arith.constant dense<0.000000e+00> : vector<8x32xf32>
    %56 = tpu.matmul %50, %12, %cst_47 {dimension_numbers = #tpu.dot_dimension_numbers<[1], [0], [0], [1], [0, 0, 1, 1], [], []>} : vector<8x32xf32>, vector<32x32xf32>, vector<8x32xf32> -> vector<8x32xf32>
    %57 = arith.addf %55, %56 : vector<8x32xf32>
    %58 = math.tanh %57 : vector<8x32xf32>
    %c5_48 = arith.constant 5 : index
    %c0_49 = arith.constant 0 : index
    %c0_50 = arith.constant 0 : index
    %59 = vector.load %arg9[%c5_48, %c0_49, %c0_50] : memref<8x8x32xf32, #tpu.memory_space<vmem>>, vector<1x8x32xf32>
    %60 = vector.shape_cast %59 : vector<1x8x32xf32> to vector<8x32xf32>
    %61 = vector.shape_cast %58 : vector<8x32xf32> to vector<1x8x32xf32>
    tpu.vector_store %arg9[%c5_48, %c0_49, %c0_50], %61 {strides = array<i32>} : memref<8x8x32xf32, #tpu.memory_space<vmem>>, vector<1x8x32xf32>,
    %c6 = arith.constant 6 : index
    %c0_51 = arith.constant 0 : index
    %c0_52 = arith.constant 0 : index
    %62 = vector.load %arg8[%c6, %c0_51, %c0_52] : memref<8x8x32xf32, #tpu.memory_space<vmem>>, vector<1x8x32xf32>
    %63 = vector.shape_cast %62 : vector<1x8x32xf32> to vector<8x32xf32>
    %cst_53 = arith.constant dense<0.000000e+00> : vector<8x32xf32>
    %64 = tpu.matmul %58, %12, %cst_53 {dimension_numbers = #tpu.dot_dimension_numbers<[1], [0], [0], [1], [0, 0, 1, 1], [], []>} : vector<8x32xf32>, vector<32x32xf32>, vector<8x32xf32> -> vector<8x32xf32>
    %65 = arith.addf %63, %64 : vector<8x32xf32>
    %66 = math.tanh %65 : vector<8x32xf32>
    %c6_54 = arith.constant 6 : index
    %c0_55 = arith.constant 0 : index
    %c0_56 = arith.constant 0 : index
    %67 = vector.load %arg9[%c6_54, %c0_55, %c0_56] : memref<8x8x32xf32, #tpu.memory_space<vmem>>, vector<1x8x32xf32>
    %68 = vector.shape_cast %67 : vector<1x8x32xf32> to vector<8x32xf32>
    %69 = vector.shape_cast %66 : vector<8x32xf32> to vector<1x8x32xf32>
    tpu.vector_store %arg9[%c6_54, %c0_55, %c0_56], %69 {strides = array<i32>} : memref<8x8x32xf32, #tpu.memory_space<vmem>>, vector<1x8x32xf32>,
    %c7 = arith.constant 7 : index
    %c0_57 = arith.constant 0 : index
    %c0_58 = arith.constant 0 : index
    %70 = vector.load %arg8[%c7, %c0_57, %c0_58] : memref<8x8x32xf32, #tpu.memory_space<vmem>>, vector<1x8x32xf32>
    %71 = vector.shape_cast %70 : vector<1x8x32xf32> to vector<8x32xf32>
    %cst_59 = arith.constant dense<0.000000e+00> : vector<8x32xf32>
    %72 = tpu.matmul %66, %12, %cst_59 {dimension_numbers = #tpu.dot_dimension_numbers<[1], [0], [0], [1], [0, 0, 1, 1], [], []>} : vector<8x32xf32>, vector<32x32xf32>, vector<8x32xf32> -> vector<8x32xf32>
    %73 = arith.addf %71, %72 : vector<8x32xf32>
    %74 = math.tanh %73 : vector<8x32xf32>
    %c7_60 = arith.constant 7 : index
    %c0_61 = arith.constant 0 : index
    %c0_62 = arith.constant 0 : index
    %75 = vector.load %arg9[%c7_60, %c0_61, %c0_62] : memref<8x8x32xf32, #tpu.memory_space<vmem>>, vector<1x8x32xf32>
    %76 = vector.shape_cast %75 : vector<1x8x32xf32> to vector<8x32xf32>
    %77 = vector.shape_cast %74 : vector<8x32xf32> to vector<1x8x32xf32>
    tpu.vector_store %arg9[%c7_60, %c0_61, %c0_62], %77 {strides = array<i32>} : memref<8x8x32xf32, #tpu.memory_space<vmem>>, vector<1x8x32xf32>,
    %c0_63 = arith.constant 0 : index
    %c0_64 = arith.constant 0 : index
    %78 = vector.load %arg7[%c0_63, %c0_64] : memref<8x32xf32, #tpu.memory_space<vmem>>, vector<8x32xf32>
    tpu.vector_store %arg7[%c0_63, %c0_64], %74 {strides = array<i32>} : memref<8x32xf32, #tpu.memory_space<vmem>>, vector<8x32xf32>,
    %c0_65 = arith.constant 0 : index
    %c0_66 = arith.constant 0 : index
    %c0_67 = arith.constant 0 : index
    %79 = vector.load %arg9[%c0_65, %c0_66, %c0_67] : memref<8x8x32xf32, #tpu.memory_space<vmem>>, vector<8x8x32xf32>
    %c0_68 = arith.constant 0 : index
    %c0_69 = arith.constant 0 : index
    %c0_70 = arith.constant 0 : index
    %80 = vector.load %arg6[%c0_68, %c0_69, %c0_70] : memref<8x8x32xf32, #tpu.memory_space<vmem>>, vector<8x8x32xf32>
    tpu.vector_store %arg6[%c0_68, %c0_69, %c0_70], %79 {strides = array<i32>} : memref<8x8x32xf32, #tpu.memory_space<vmem>>, vector<8x8x32xf32>,
    return
  }
  func.func @transform_0(%arg0: i32, %arg1: i32) -> (i32, i32, i32) {
    %c0_i32 = arith.constant 0 : i32
    %c0_i32_0 = arith.constant 0 : i32
    return %arg1, %arg0, %c0_i32 : i32, i32, i32
  }
  func.func @transform_1(%arg0: i32, %arg1: i32) -> (i32, i32) {
    %c0_i32 = arith.constant 0 : i32
    %c0_i32_0 = arith.constant 0 : i32
    %c0_i32_1 = arith.constant 0 : i32
    return %c0_i32, %c0_i32_0 : i32, i32
  }
  func.func @transform_2(%arg0: i32, %arg1: i32) -> (i32, i32) {
    %c0_i32 = arith.constant 0 : i32
    %c0_i32_0 = arith.constant 0 : i32
    %c0_i32_1 = arith.constant 0 : i32
    return %c0_i32, %c0_i32_0 : i32, i32
  }
  func.func @transform_3(%arg0: i32, %arg1: i32) -> (i32, i32) {
    %c0_i32 = arith.constant 0 : i32
    %c0_i32_0 = arith.constant 0 : i32
    %c0_i32_1 = arith.constant 0 : i32
    return %c0_i32, %c0_i32_0 : i32, i32
  }
  func.func @transform_4(%arg0: i32, %arg1: i32) -> (i32, i32, i32) {
    %c0_i32 = arith.constant 0 : i32
    %c0_i32_0 = arith.constant 0 : i32
    return %arg1, %arg0, %c0_i32 : i32, i32, i32
  }
}

</mosaic_0001>

<bundles_post_ra>
// kernel: tpu_custom_call.1
= control target key start
LH: loop header
LB: loop body
LE: loop exit
PB: predicated region body
PF: predicated region fallthrough
CT: control target
= control target key end

     0   :  { %9 = vsyncpa [#allocation6], 0  ;;  %s687_s0 = inlined_call_operand.hbm [shape: f32[8,8,16], index: 0, kind: input, shape index: {}]   ;;  %s688_s1 = inlined_call_operand.hbm [shape: f32[16,32], index: 1, kind: input, shape index: {}]   ;;  %s689_s2 = inlined_call_operand.hbm [shape: f32[32,32], index: 2, kind: input, shape index: {}]   ;;  %s690_s3 = inlined_call_operand.vmem [shape: f32[1,32], index: 3, kind: input, shape index: {}]   ;;  %s691_s4 = inlined_call_operand.hbm [shape: f32[8,8,32], index: 4, kind: output, shape index: {}]  }
   0x1   :  { %10 = vsyncpa [#allocation9], 0 }
   0x2   :  { %11 = vsyncpa [#allocation7], 0  ;;  %s29_s17 = sshll.u32 %s688_s1, 4  ;;  %s576_s18 = smov [#allocation8]   ;;  %s30_s17 = int_to_ptr.hbm [resolvable:$true] %s29_s17 }
   0x3   :  { %s31_s19 = sshll.u32 %s576_s18, 4  ;;  %s16_s22 = sshll.u32 %s687_s0, 4  ;;  %s32_s19 = int_to_ptr.vmem [resolvable:$true] %s31_s19  ;;  %s17_s22 = int_to_ptr.hbm [resolvable:$true] %s16_s22 }
   0x4   :  { %s577_s23 = smov 128   ;;  %s578_s24 = smov 8  }
   0x5   :  { %37 = dma.hbm_to_vmem [thread:$0]  %s30_s17, 256, %s32_s19, [#allocation9], %s577_s23, %s577_s23, %s578_s24  }
   0x6   :  { %s579_s25 = smov [#allocation5]   ;;  %s42_s1 = sshll.u32 %s689_s2, 4  ;;  %s43_s1 = int_to_ptr.hbm [resolvable:$true] %s42_s1 }
   0x7   :  { %s18_s26 = sshll.u32 %s579_s25, 4  ;;  %s580_s0 = smov [#allocation10]   ;;  %s19_s26 = int_to_ptr.vmem [resolvable:$true] %s18_s26 }
   0x8   :  { %24 = dma.hbm_to_vmem [thread:$0]  %s17_s22, 1024, %s19_s26, [#allocation6], %s577_s23, %s577_s23, %s578_s24  }
   0x9   :  { %s44_s29 = sshll.u32 %s580_s0, 4  ;;  %s45_s29 = int_to_ptr.vmem [resolvable:$true] %s44_s29 }
   0xa   :  { %50 = dma.hbm_to_vmem [thread:$0]  %s43_s1, 512, %s45_s29, [#allocation9], %s577_s23, %s577_s23, %s578_s24  }
   0xb   :  { %570 = dma.done.wait [#allocation6], 1024  }
   0xc   :  { %571 = vsyncadd [#allocation6], 4294966272 }
   0xd   :  { %572 = dma.done.wait [#allocation9], 768  }
   0xe   :  { %573 = vsyncadd [#allocation9], 4294966528  ;;  %vm69_vm0 = vcmask 261120   ;;  %v581_v0 = vmov 0.0   ;;  %v80_v1 = vld [vmem:[#allocation8 + $0x8] sm:$0xff]  ;;  %v79_v2 = vld [vmem:[#allocation8] sm:$0xff] }
   0xf   :  { %70 = vst.msk [vmem:[#allocation2] sm:$0xff] %vm69_vm0, %v581_v0  ;;  %124 = vmatpush.msra.mxu0 %v80_v1  ;;  %v71_v3 = vld [vmem:[#allocation5] sm:$0xff]  ;;  %vm85_vm1 = vcmask 130048   ;;  %v163_v4 = vld [vmem:[#allocation10 + $0x18] sm:$0xff]  ;;  %448 = vmatpush.msra.mxu3 %v80_v1  ;;  %v161_v6 = vld [vmem:[#allocation10 + $0x8] sm:$0xff]  ;;  %s418_s8 = sshll.u32 %s691_s4, 4  ;;  %s419_s8 = int_to_ptr.hbm [resolvable:$true] %s418_s8 }
  0x10   :  { %v162_v5 = vld [vmem:[#allocation10 + $0x10] sm:$0xff]  ;;  %181 = vmatpush.msra.mxu1 %v163_v4  ;;  %209 = vmatpush.msra.mxu2 %v163_v4  ;;  %v160_v7 = vld [vmem:[#allocation10] sm:$0xff]  ;;  %v72_v9 = vld [vmem:[#allocation5 + $0x8] sm:$0xff] }
  0x11   :  { %125 = vmatpush.msra.mxu0 %v79_v2  ;;  %449 = vmatpush.msra.mxu3 %v79_v2  ;;  %v76_v10 = vld [vmem:[#allocation5 + $0x28] sm:$0xff]  ;;  %v634_v11 = vld [vmem:[%s690_s3] ss:$0 sm:$0xff]  ;;  %v77_v19 = vld [vmem:[#allocation5 + $0x30] sm:$0xff]  ;;  %s582_s3 = smov [#allocation11]  }
  0x12   :  { %432 = vmatmul.msk.f32.vlgmr.msra.gmra.mxu0 %vm85_vm1, %v71_v3  ;;  %182 = vmatpush.msra.mxu1 %v162_v5  ;;  %v78_v22 = vld [vmem:[#allocation5 + $0x38] sm:$0xff]  ;;  %v73_v23 = vld [vmem:[#allocation5 + $0x10] sm:$0xff]  ;;  %v75_v45 = vld [vmem:[#allocation5 + $0x20] sm:$0xff]  ;;  %s416_s5 = sshll.u32 %s582_s3, 4  ;;  %s417_s5 = int_to_ptr.vmem [resolvable:$true] %s416_s5 }
  0x13   :  { %210 = vmatpush.msra.mxu2 %v162_v5  ;;  %238 = vmatpush.msrb.mxu3 %v163_v4  ;;  %v74_v33 = vld [vmem:[#allocation5 + $0x18] sm:$0xff] }
  0x14   :  { %183 = vmatpush.msra.mxu1 %v161_v6  ;;  %437 = vmatmul.msk.f32.vlgmr.msra.gmra.mxu3 %vm85_vm1, %v76_v10 }
  0x15   :  { %211 = vmatpush.msra.mxu2 %v161_v6  ;;  %239 = vmatpush.msrb.mxu3 %v162_v5 }
  0x16   :  { %v164_v8 = vld [vmem:[#allocation2] sm:$0xff]  ;;  %184 = vmatpush.msra.mxu1 %v160_v7 }
  0x17   :  { %440 = vmatmul.msk.f32.vlgmr.msra.gmra.mxu1 %vm69_vm0, %v164_v8  ;;  %212 = vmatpush.msra.mxu2 %v160_v7 }
  0x18   :  { %240 = vmatpush.msrb.mxu3 %v161_v6  ;;  %267 = vmatpush.msrb.mxu1 %v163_v4 }
  0x19   :  { %296 = vmatpush.msrb.mxu2 %v163_v4 }
  0x1a   :  { %241 = vmatpush.msrb.mxu3 %v160_v7  ;;  %268 = vmatpush.msrb.mxu1 %v162_v5 }
  0x1b   :  { %297 = vmatpush.msrb.mxu2 %v162_v5  ;;  %433 = vmatmul.msk.f32.gmra.mxu0 %vm85_vm1, %v72_v9 }
  0x1c   :  { %269 = vmatpush.msrb.mxu1 %v161_v6  ;;  %325 = vmatpush.msra.mxu3 %v163_v4 }
  0x1d   :  { %298 = vmatpush.msrb.mxu2 %v161_v6  ;;  %438 = vmatmul.msk.f32.gmra.mxu3 %vm85_vm1, %v77_v19 }
  0x1e   :  { %270 = vmatpush.msrb.mxu1 %v160_v7  ;;  %326 = vmatpush.msra.mxu3 %v162_v5 }
  0x1f   :  { %299 = vmatpush.msrb.mxu2 %v160_v7 }
  0x20   :  { %354 = vmatpush.msra.mxu1 %v163_v4  ;;  %327 = vmatpush.msra.mxu3 %v161_v6 }
  0x22   :  { %355 = vmatpush.msra.mxu1 %v162_v5  ;;  %328 = vmatpush.msra.mxu3 %v160_v7 }
  0x23   :  { %434 = vmatmul.msk.f32.gmra.mxu0 %vm85_vm1, %v73_v23 }
  0x24   :  { %356 = vmatpush.msra.mxu1 %v161_v6 }
  0x25   :  { %439 = vmatmul.msk.f32.gmra.mxu3 %vm85_vm1, %v78_v22 }
  0x26   :  { %357 = vmatpush.msra.mxu1 %v160_v7 }
  0x2b   :  { %435 = vmatmul.msk.f32.gmra.mxu0 %vm85_vm1, %v74_v33 }
  0x33   :  { %436 = vmatmul.msk.f32.gmra.mxu0 %vm85_vm1, %v75_v45 }
  0x8f   :  { %v127_v12 = vpop.f32.mrf.mxu0 }
  0x90   :  { %v128_v13 = vadd.f32 %v634_v11, %v127_v12 }
  0x92   :  { %152 = vst.msk [vmem:[#allocation3] sm:$0xff] %vm69_vm0, %v128_v13 }
  0x94   :  { %v186_v14 = vpop.f32.mrf.mxu1 }
  0x97   :  { %v142_v24 = vpop.f32.mrf.mxu3 }
  0x98   :  { %v130_v20 = vpop.f32.mrf.mxu0  ;;  %v143_v25 = vadd.f32 %v634_v11, %v142_v24 }
  0x99   :  { %v165_v15 = vld [vmem:[#allocation3] sm:$0xff]  ;;  %v131_v21 = vadd.f32 %v634_v11, %v130_v20 }
  0x9a   :  { %v189_v16 = vadd.f32 %v186_v14, %v165_v15  ;;  %157 = vst.msk [vmem:[#allocation3 + $0x28] sm:$0xff] %vm69_vm0, %v143_v25 }
  0x9b   :  { %153 = vst.msk [vmem:[#allocation3 + $0x8] sm:$0xff] %vm69_vm0, %v131_v21 }
  0x9c   :  { %458 = vtanh.f32 %v189_v16 }
  0xa0   :  { %v145_v31 = vpop.f32.mrf.mxu3  ;;  %v133_v34 = vpop.f32.mrf.mxu0 }
  0xa1   :  { %v146_v32 = vadd.f32 %v634_v11, %v145_v31  ;;  %v134_v35 = vadd.f32 %v634_v11, %v133_v34  ;;  %v309_v58 = vld [vmem:[#allocation3 + $0x28] sm:$0xff] }
  0xa2   :  { %v459_v17 = vpop.eup %458  ;;  %v193_v26 = vld [vmem:[#allocation3 + $0x8] sm:$0xff] }
  0xa3   :  { %191 = vst.msk [vmem:[#allocation4] sm:$0xff] %vm69_vm0, %v459_v17  ;;  %441 = vmatmul.msk.f32.vlgmr.msra.gmra.mxu2 %vm69_vm0, %v459_v17 }
  0xa4   :  { %383 = vmatpush.msra.mxu2 %v163_v4  ;;  %158 = vst.msk [vmem:[#allocation3 + $0x30] sm:$0xff] %vm69_vm0, %v146_v32 }
  0xa5   :  { %154 = vst.msk [vmem:[#allocation3 + $0x10] sm:$0xff] %vm69_vm0, %v134_v35 }
  0xa6   :  { %384 = vmatpush.msra.mxu2 %v162_v5 }
  0xa8   :  { %385 = vmatpush.msra.mxu2 %v161_v6  ;;  %v148_v36 = vpop.f32.mrf.mxu3  ;;  %v136_v43 = vpop.f32.mrf.mxu0 }
  0xa9   :  { %v149_v37 = vadd.f32 %v634_v11, %v148_v36  ;;  %v137_v44 = vadd.f32 %v634_v11, %v136_v43 }
  0xaa   :  { %386 = vmatpush.msra.mxu2 %v160_v7  ;;  %v396_v18 = vld [vmem:[#allocation4] sm:$0xff] }
  0xab   :  { %404 = vst.msk [vmem:[#allocation11] sm:$0xff] %vm69_vm0, %v396_v18  ;;  %v338_v63 = vld [vmem:[#allocation3 + $0x30] sm:$0xff] }
  0xac   :  { %159 = vst.msk [vmem:[#allocation3 + $0x38] sm:$0xff] %vm69_vm0, %v149_v37  ;;  %v222_v38 = vld [vmem:[#allocation3 + $0x10] sm:$0xff] }
  0xad   :  { %155 = vst.msk [vmem:[#allocation3 + $0x18] sm:$0xff] %vm69_vm0, %v137_v44 }
  0xb0   :  { %v139_v51 = vpop.f32.mrf.mxu0 }
  0xb1   :  { %v140_v52 = vadd.f32 %v634_v11, %v139_v51 }
  0xb3   :  { %156 = vst.msk [vmem:[#allocation3 + $0x20] sm:$0xff] %vm69_vm0, %v140_v52  ;;  %v367_v4 = vld [vmem:[#allocation3 + $0x38] sm:$0xff] }
  0xb4   :  { %v251_v46 = vld [vmem:[#allocation3 + $0x18] sm:$0xff] }
  0xba   :  { %v280_v53 = vld [vmem:[#allocation3 + $0x20] sm:$0xff] }
 0x126   :  { %v214_v27 = vpop.f32.mrf.mxu2 }
 0x127   :  { %v217_v28 = vadd.f32 %v214_v27, %v193_v26 }
 0x129   :  { %460 = vtanh.f32 %v217_v28 }
 0x12f   :  { %v461_v29 = vpop.eup %460 }
 0x130   :  { %220 = vst.msk [vmem:[#allocation4 + $0x8] sm:$0xff] %vm69_vm0, %v461_v29  ;;  %442 = vmatmul.msk.f32.vlgmr.msrb.gmra.mxu3 %vm69_vm0, %v461_v29 }
 0x137   :  { %v397_v30 = vld [vmem:[#allocation4 + $0x8] sm:$0xff] }
 0x138   :  { %405 = vst.msk [vmem:[#allocation11 + $0x8] sm:$0xff] %vm69_vm0, %v397_v30 }
 0x1b3   :  { %v243_v39 = vpop.f32.mrf.mxu3 }
 0x1b4   :  { %v246_v40 = vadd.f32 %v243_v39, %v222_v38 }
 0x1b6   :  { %462 = vtanh.f32 %v246_v40 }
 0x1bc   :  { %v463_v41 = vpop.eup %462 }
 0x1bd   :  { %249 = vst.msk [vmem:[#allocation4 + $0x10] sm:$0xff] %vm69_vm0, %v463_v41  ;;  %443 = vmatmul.msk.f32.vlgmr.msrb.gmra.mxu1 %vm69_vm0, %v463_v41 }
 0x1c4   :  { %v398_v42 = vld [vmem:[#allocation4 + $0x10] sm:$0xff] }
 0x1c5   :  { %406 = vst.msk [vmem:[#allocation11 + $0x10] sm:$0xff] %vm69_vm0, %v398_v42 }
 0x23a   :  { %v272_v47 = vpop.f32.mrf.mxu1 }
 0x23b   :  { %v275_v48 = vadd.f32 %v272_v47, %v251_v46 }
 0x23d   :  { %464 = vtanh.f32 %v275_v48 }
 0x243   :  { %v465_v49 = vpop.eup %464 }
 0x244   :  { %278 = vst.msk [vmem:[#allocation4 + $0x18] sm:$0xff] %vm69_vm0, %v465_v49  ;;  %444 = vmatmul.msk.f32.vlgmr.msrb.gmra.mxu2 %vm69_vm0, %v465_v49 }
 0x24b   :  { %v399_v50 = vld [vmem:[#allocation4 + $0x18] sm:$0xff] }
 0x24c   :  { %407 = vst.msk [vmem:[#allocation11 + $0x18] sm:$0xff] %vm69_vm0, %v399_v50 }
 0x2c7   :  { %v301_v54 = vpop.f32.mrf.mxu2 }
 0x2c8   :  { %v304_v55 = vadd.f32 %v301_v54, %v280_v53 }
 0x2ca   :  { %466 = vtanh.f32 %v304_v55 }
 0x2d0   :  { %v467_v56 = vpop.eup %466 }
 0x2d1   :  { %307 = vst.msk [vmem:[#allocation4 + $0x20] sm:$0xff] %vm69_vm0, %v467_v56  ;;  %445 = vmatmul.msk.f32.vlgmr.msra.gmra.mxu3 %vm69_vm0, %v467_v56 }
 0x2d8   :  { %v400_v57 = vld [vmem:[#allocation4 + $0x20] sm:$0xff] }
 0x2d9   :  { %408 = vst.msk [vmem:[#allocation11 + $0x20] sm:$0xff] %vm69_vm0, %v400_v57 }
 0x354   :  { %v330_v59 = vpop.f32.mrf.mxu3 }
 0x355   :  { %v333_v60 = vadd.f32 %v330_v59, %v309_v58 }
 0x357   :  { %468 = vtanh.f32 %v333_v60 }
 0x35d   :  { %v469_v61 = vpop.eup %468 }
 0x35e   :  { %336 = vst.msk [vmem:[#allocation4 + $0x28] sm:$0xff] %vm69_vm0, %v469_v61  ;;  %446 = vmatmul.msk.f32.vlgmr.msra.gmra.mxu1 %vm69_vm0, %v469_v61 }
 0x365   :  { %v401_v62 = vld [vmem:[#allocation4 + $0x28] sm:$0xff] }
 0x366   :  { %409 = vst.msk [vmem:[#allocation11 + $0x28] sm:$0xff] %vm69_vm0, %v401_v62 }
 0x3db   :  { %v359_v0 = vpop.f32.mrf.mxu1 }
 0x3dc   :  { %v362_v1 = vadd.f32 %v359_v0, %v338_v63 }
 0x3de   :  { %470 = vtanh.f32 %v362_v1 }
 0x3e4   :  { %v471_v2 = vpop.eup %470 }
 0x3e5   :  { %365 = vst.msk [vmem:[#allocation4 + $0x30] sm:$0xff] %vm69_vm0, %v471_v2  ;;  %447 = vmatmul.msk.f32.vlgmr.msra.gmra.mxu2 %vm69_vm0, %v471_v2 }
 0x3ec   :  { %v402_v3 = vld [vmem:[#allocation4 + $0x30] sm:$0xff] }
 0x3ed   :  { %410 = vst.msk [vmem:[#allocation11 + $0x30] sm:$0xff] %vm69_vm0, %v402_v3 }
 0x468   :  { %v388_v5 = vpop.f32.mrf.mxu2 }
 0x469   :  { %v391_v6 = vadd.f32 %v388_v5, %v367_v4 }
 0x46b   :  { %472 = vtanh.f32 %v391_v6 }
 0x471   :  { %v473_v7 = vpop.eup %472 }
 0x472   :  { %394 = vst.msk [vmem:[#allocation4 + $0x38] sm:$0xff] %vm69_vm0, %v473_v7 }
 0x473   :  { %395 = vst.msk [vmem:[#allocation2] sm:$0xff] %vm69_vm0, %v473_v7 }
 0x479   :  { %v403_v8 = vld [vmem:[#allocation4 + $0x38] sm:$0xff] }
 0x47a   :  { %411 = vst.msk [vmem:[#allocation11 + $0x38] sm:$0xff] %vm69_vm0, %v403_v8 }
 0x47b   :  { %424 = dma.vmem_to_hbm [thread:$0]  %s417_s5, 1024, %s419_s8, [#allocation7], %s577_s23, %s577_s23, %s578_s24  }
 0x47c   :  { %574 = dma.done.wait [#allocation7], 1024  }
 0x47d   :  { %575 = vsyncadd [#allocation7], 4294966272 }
 0x47e   :  { %429 = vsyncpa [#allocation6], 1 }
 0x47f   :  { %430 = vsyncpa [#allocation9], 1 }
 0x480   :  { %431 = vsyncpa [#allocation7], 1 }

</bundles_post_ra>
